<compile_context>
chip_gen: v5e
topology: v5e:2x2
jax: 0.10.0
libtpu: 0.0.40
codegen_flags: <defaults>
</compile_context>

<pallas_src>
import functools
import math

import jax
import jax.numpy as jnp
from jax import lax
from jax.experimental import pallas as pl
from jax.experimental.pallas import tpu as pltpu

LN_EPS = 1e-5
_INV_SQRT_2 = 1.0 / math.sqrt(2.0)
_SQRT_2_OVER_PI = math.sqrt(2.0 / math.pi)


# --------------------------------------------------------------------------
# In-kernel math
# --------------------------------------------------------------------------
def _gelu(y, approximate):
    if approximate:
        # tanh approximation: the transcendental routes through the EUP slot
        # (otherwise idle), halving VALU pressure on v6e/v7x.  Numerics differ
        # slightly from nn.GELU(approximate='none') -> off by default.
        inner = _SQRT_2_OVER_PI * (y + 0.044715 * (y * y * y))
        return 0.5 * y * (1.0 + jnp.tanh(inner))
    # Exact erf GELU, matches nn.GELU() default.
    return 0.5 * y * (1.0 + lax.erf(y * _INV_SQRT_2))


def _epilogue(y, vec, approximate_gelu):
    # y: [TM, D] f32 accumulator.  vec: [3, D] f32 rows = (b, ln_w, ln_b).
    y = y + vec[0:1, :]
    y = _gelu(y, approximate_gelu)
    # Single-pass LN statistics: mean-of-centered-squares == E[y^2] - mu^2.
    mu = jnp.mean(y, axis=-1, keepdims=True)
    ms = jnp.mean(y * y, axis=-1, keepdims=True)
    inv = lax.rsqrt(jnp.maximum(ms - mu * mu, 0.0) + LN_EPS)
    return (y - mu) * inv * vec[1:2, :] + vec[2:3, :]


def _mlm_head_resident_kernel(x_ref, w_ref, vec_ref, o_ref, *, approximate_gelu):
    # x: [TM, D_in], w: [D_out, D_in] (resident), vec: [3, D] f32 (resident).
    y = lax.dot_general(
        x_ref[...], w_ref[...],
        dimension_numbers=(((1,), (1,)), ((), ())),   # x @ W.T, no wrapper transpose
        preferred_element_type=jnp.float32,
    )
    o_ref[...] = _epilogue(y, vec_ref[...], approximate_gelu).astype(o_ref.dtype)


def _mlm_head_ktiled_kernel(x_ref, w_ref, vec_ref, o_ref, acc_ref, *,
                            approximate_gelu):
    # Grid = (row_tiles, k_tiles).  x: [TM, TK], w: [D_out, TK], acc: [TM, D] f32.
    k = pl.program_id(1)

    @pl.when(k == 0)
    def _():
        acc_ref[...] = jnp.zeros_like(acc_ref)

    acc_ref[...] += lax.dot_general(
        x_ref[...], w_ref[...],
        dimension_numbers=(((1,), (1,)), ((), ())),
        preferred_element_type=jnp.float32,
    )

    @pl.when(k == pl.num_programs(1) - 1)
    def _():
        o_ref[...] = _epilogue(acc_ref[...], vec_ref[...],
                               approximate_gelu).astype(o_ref.dtype)


# --------------------------------------------------------------------------
# Wrapper
# --------------------------------------------------------------------------
def _round_up(n, m):
    return ((n + m - 1) // m) * m


def _vmem_budget_bytes():
    """Generation-aware usable-VMEM budget (with headroom reserved)."""
    cap = 64 << 20  # conservative default == v7x per-TensorCore VMEM
    try:
        info = pltpu.get_tpu_info()
        cap = int(getattr(info, "vmem_capacity_bytes", cap) or cap)
    except Exception:
        pass
    # Reserve headroom for compiler-internal scratch; cap at ~100 MiB so we do
    # not request more scoped VMEM than is sensible even on 128 MiB parts.
    return min(cap - (8 << 20), 100 << 20)


def bert_mlm_head(resid, W, b, ln_w, ln_b, *,
                  block_rows=1024,
                  k_block=None,
                  compute_dtype=None,
                  out_dtype=None,
                  approximate_gelu=False,
                  force_k_tiling=False):
    """BertMLMHead forward.

    resid: [batch, pos, d_model]; W: [d_model, d_model] (W[out, in]);
    b / ln_w / ln_b: [d_model].

    Defaults reproduce the exact f32 PyTorch semantics.  For peak throughput
    pass compute_dtype=jnp.bfloat16 (MXU full rate, f32 accumulate) and/or
    out_dtype=jnp.bfloat16 (halved writeback) -- both change numerics slightly.
    """
    batch, pos, d_model = resid.shape
    rows = batch * pos
    out_dtype = resid.dtype if out_dtype is None else out_dtype

    x2d = resid.reshape(rows, d_model)
    w2d = W
    if compute_dtype is not None:
        x2d = x2d.astype(compute_dtype)
        w2d = w2d.astype(compute_dtype)

    x_bytes = jnp.dtype(x2d.dtype).itemsize
    w_bytes = jnp.dtype(w2d.dtype).itemsize
    o_bytes = jnp.dtype(out_dtype).itemsize
    budget = _vmem_budget_bytes()

    # ---- row tile -----------------------------------------------------------
    tm = min(block_rows, _round_up(rows, 8))
    tm = max(8, (tm // 8) * 8)

    # ---- strategy: resident W vs K-tiled ------------------------------------
    def est_resident(tm_):
        return (2 * tm_ * d_model * (x_bytes + o_bytes)   # double-buffered x/out tiles
                + d_model * d_model * w_bytes             # resident W (single copy)
                + 4 * tm_ * d_model * 4                   # f32 epilogue headroom
                + (2 << 20))

    use_ktiled = force_k_tiling or est_resident(min(tm, 128)) > budget

    if use_ktiled:
        if k_block is not None:
            tk = k_block
        else:
            tk = min(512, d_model)
            while tk > 128 and (d_model % tk != 0 or tk % 128 != 0):
                tk -= 128
            if d_model % tk != 0 or (tk % 128 != 0 and tk != d_model):
                tk = d_model  # TODO(synk): pad K when d_model is not a multiple of 128
        assert d_model % tk == 0 and (tk % 128 == 0 or tk == d_model), \
            "k_block must divide d_model and be a multiple of 128 (or == d_model)"
        n_k = d_model // tk

        def est(tm_):
            return (2 * tm_ * tk * x_bytes
                    + 2 * d_model * tk * w_bytes
                    + 2 * tm_ * d_model * o_bytes
                    + tm_ * d_model * 4                   # accumulator scratch
                    + 4 * tm_ * d_model * 4
                    + (2 << 20))
    else:
        tk = d_model
        n_k = 1
        est = est_resident

    # Shrink the row tile until the estimate fits the per-core budget.
    while tm > 8 and est(tm) > budget:
        tm = max(8, ((tm // 2) // 8) * 8)

    n_tiles = pl.cdiv(rows, tm)
    # Keep the "parallel" row axis splittable across v7x's two TensorCores.
    if n_tiles % 2 == 1 and rows > 8:
        tm_even = max(8, _round_up(pl.cdiv(rows, n_tiles + 1), 8))
        if pl.cdiv(rows, tm_even) % 2 == 0:
            tm = tm_even
            n_tiles = pl.cdiv(rows, tm)
    rows_padded = n_tiles * tm

    if rows_padded != rows:
        # LN is per-row, so padded rows never pollute real ones.
        x2d = jnp.pad(x2d, ((0, rows_padded - rows), (0, 0)))

    # b / ln_w / ln_b packed into a single resident f32 [3, d_model] operand.
    vec = jnp.stack([b.astype(jnp.float32),
                     ln_w.astype(jnp.float32),
                     ln_b.astype(jnp.float32)], axis=0)

    est_vmem = est(tm)
    vmem_limit = int(min(budget, max(32 << 20, est_vmem)))

    cost = pl.CostEstimate(
        flops=2 * rows_padded * d_model * d_model,
        transcendentals=rows_padded * d_model,
        bytes_accessed=(rows_padded * d_model * (x_bytes + o_bytes)
                        + d_model * d_model * w_bytes
                        + 3 * d_model * 4),
    )

    def launch(single_buffer_resident):
        def resident_spec(block_shape, index_map):
            # Constant index_map -> operand is DMA'd once and stays resident;
            # Buffered(1) drops the second (never used) buffer copy.
            if single_buffer_resident and hasattr(pl, "Buffered"):
                return pl.BlockSpec(block_shape, index_map,
                                    pipeline_mode=pl.Buffered(1))
            return pl.BlockSpec(block_shape, index_map)

        if use_ktiled:
            kernel = functools.partial(_mlm_head_ktiled_kernel,
                                       approximate_gelu=approximate_gelu)
            grid = (n_tiles, n_k)
            in_specs = [
                pl.BlockSpec((tm, tk), lambda i, k: (i, k)),            # x slab
                pl.BlockSpec((d_model, tk), lambda i, k: (0, k)),       # W slab
                resident_spec((3, d_model), lambda i, k: (0, 0)),       # b/ln_w/ln_b
            ]
            out_specs = pl.BlockSpec((tm, d_model), lambda i, k: (i, 0))
            scratch = (pltpu.VMEM((tm, d_model), jnp.float32),)
            dims = ("parallel", "arbitrary")
        else:
            kernel = functools.partial(_mlm_head_resident_kernel,
                                       approximate_gelu=approximate_gelu)
            grid = (n_tiles,)
            in_specs = [
                pl.BlockSpec((tm, d_model), lambda i: (i, 0)),          # x tile
                resident_spec((d_model, d_model), lambda i: (0, 0)),    # resident W
                resident_spec((3, d_model), lambda i: (0, 0)),          # b/ln_w/ln_b
            ]
            out_specs = pl.BlockSpec((tm, d_model), lambda i: (i, 0))
            scratch = ()
            dims = ("parallel",)

        return pl.pallas_call(
            kernel,
            out_shape=jax.ShapeDtypeStruct((rows_padded, d_model), out_dtype),
            grid=grid,
            in_specs=in_specs,
            out_specs=out_specs,
            scratch_shapes=scratch,
            compiler_params=pltpu.CompilerParams(
                dimension_semantics=dims,
                vmem_limit_bytes=vmem_limit,
            ),
            cost_estimate=cost,
        )(x2d, w2d, vec)

    try:
        out2d = launch(True)
    except Exception:
        # Fallback if single-buffered resident operands (pl.Buffered(1)) are not
        # supported by this jax version: default double-buffered BlockSpecs.
        out2d = launch(False)

    if rows_padded != rows:
        out2d = out2d[:rows]
    return out2d.reshape(batch, pos, d_model)


# --------------------------------------------------------------------------
# Pure-JAX reference mirroring the PyTorch module exactly
# --------------------------------------------------------------------------
def _reference(resid, W, b, ln_w, ln_b):
    y = (resid[..., None, :] * W).sum(-1) + b
    y = 0.5 * y * (1.0 + lax.erf(y / jnp.sqrt(2.0)))
    mu = jnp.mean(y, axis=-1, keepdims=True)
    yc = y - mu
    scale = jnp.sqrt(jnp.mean(yc * yc, axis=-1, keepdims=True) + LN_EPS)
    return yc / scale * ln_w + ln_b


if __name__ == "__main__":
    key = jax.random.PRNGKey(0)

    # ---- small test, resident-W path ----------------------------------------
    batch, pos, d_model = 2, 8, 32
    k_resid, k_w, k_b, k_lnw, k_lnb, k2 = jax.random.split(key, 6)

    resid = jax.random.normal(k_resid, (batch, pos, d_model), dtype=jnp.float32)
    W = jax.random.normal(k_w, (d_model, d_model), dtype=jnp.float32) / math.sqrt(d_model)
    b = jax.random.normal(k_b, (d_model,), dtype=jnp.float32) * 0.1
    ln_w = 1.0 + 0.1 * jax.random.normal(k_lnw, (d_model,), dtype=jnp.float32)
    ln_b = 0.1 * jax.random.normal(k_lnb, (d_model,), dtype=jnp.float32)

    out = bert_mlm_head(resid, W, b, ln_w, ln_b)
    jax.block_until_ready(out)
    ref = _reference(resid, W, b, ln_w, ln_b)
    assert out.shape == (batch, pos, d_model)
    # Tolerance allows for MXU f32 matmuls internally using bf16 multi-pass at
    # default precision on some generations; still catches structural errors.
    assert jnp.allclose(out, ref, atol=2e-2, rtol=2e-2), "mismatch vs reference (resident path)"

    # ---- exercise the K-tiled fallback path (used for large d_model on v7x) --
    batch2, pos2, d_model2 = 2, 16, 256
    ka, kb_, kc, kd, ke = jax.random.split(k2, 5)
    resid2 = jax.random.normal(ka, (batch2, pos2, d_model2), dtype=jnp.float32)
    W2 = jax.random.normal(kb_, (d_model2, d_model2), dtype=jnp.float32) / math.sqrt(d_model2)
    b2 = jax.random.normal(kc, (d_model2,), dtype=jnp.float32) * 0.1
    ln_w2 = 1.0 + 0.1 * jax.random.normal(kd, (d_model2,), dtype=jnp.float32)
    ln_b2 = 0.1 * jax.random.normal(ke, (d_model2,), dtype=jnp.float32)

    out2 = bert_mlm_head(resid2, W2, b2, ln_w2, ln_b2,
                         force_k_tiling=True, k_block=128)
    jax.block_until_ready(out2)
    ref2 = _reference(resid2, W2, b2, ln_w2, ln_b2)
    assert out2.shape == (batch2, pos2, d_model2)
    assert jnp.allclose(out2, ref2, atol=2e-2, rtol=2e-2), "mismatch vs reference (K-tiled path)"

    print("KERNEL_OK")
</pallas_src>

<mosaic_0001>
module attributes {stable_mosaic.version = 11 : i64} {
  func.func @_mlm_head_resident_kernel(%arg0: i32, %arg1: memref<8x32xf32, #tpu.memory_space<vmem>>, %arg2: memref<32x32xf32, #tpu.memory_space<vmem>>, %arg3: memref<3x32xf32, #tpu.memory_space<vmem>>, %arg4: memref<8x32xf32, #tpu.memory_space<vmem>>) attributes {dimension_semantics = [#tpu.dimension_semantics<parallel>], iteration_bounds = array<i64: 2>, scalar_prefetch = 0 : i64, scratch_operands = 0 : i64, tpu.core_type = #tpu.core_type<tc>, window_params = [{transform_indices = @transform_0, window_bounds = array<i64: 8, 32>}, {pipeline_mode = #tpu.pipeline_mode<synchronous>, transform_indices = @transform_1, window_bounds = array<i64: 32, 32>}, {pipeline_mode = #tpu.pipeline_mode<synchronous>, transform_indices = @transform_2, window_bounds = array<i64: 3, 32>}, {transform_indices = @transform_3, window_bounds = array<i64: 8, 32>}]} {
    %c0 = arith.constant 0 : index
    %c0_0 = arith.constant 0 : index
    %0 = vector.load %arg1[%c0, %c0_0] : memref<8x32xf32, #tpu.memory_space<vmem>>, vector<8x32xf32>
    %c0_1 = arith.constant 0 : index
    %c0_2 = arith.constant 0 : index
    %1 = vector.load %arg2[%c0_1, %c0_2] : memref<32x32xf32, #tpu.memory_space<vmem>>, vector<32x32xf32>
    %cst = arith.constant dense<0.000000e+00> : vector<8x32xf32>
    %2 = tpu.matmul %0, %1, %cst {dimension_numbers = #tpu.dot_dimension_numbers<[1], [1], [0], [0], [0, 0, 1, 0], [], []>} : vector<8x32xf32>, vector<32x32xf32>, vector<8x32xf32> -> vector<8x32xf32>
    %c0_3 = arith.constant 0 : index
    %c0_4 = arith.constant 0 : index
    %3 = vector.load %arg3[%c0_3, %c0_4] : memref<3x32xf32, #tpu.memory_space<vmem>>, vector<3x32xf32>
    %4 = vector.extract_strided_slice %3 {offsets = [0, 0], sizes = [1, 32], strides = [1, 1]} : vector<3x32xf32> to vector<1x32xf32>
    %5 = vector.broadcast %4 : vector<1x32xf32> to vector<8x32xf32>
    %6 = arith.addf %2, %5 : vector<8x32xf32>
    %cst_5 = arith.constant 5.000000e-01 : f32
    %7 = vector.broadcast %cst_5 : f32 to vector<8x32xf32>
    %8 = arith.mulf %7, %6 : vector<8x32xf32>
    %cst_6 = arith.constant 0.707106769 : f32
    %9 = vector.broadcast %cst_6 : f32 to vector<8x32xf32>
    %10 = arith.mulf %6, %9 : vector<8x32xf32>
    %11 = math.erf %10 : vector<8x32xf32>
    %cst_7 = arith.constant 1.000000e+00 : f32
    %12 = vector.broadcast %cst_7 : f32 to vector<8x32xf32>
    %13 = arith.addf %12, %11 : vector<8x32xf32>
    %14 = arith.mulf %8, %13 : vector<8x32xf32>
    %cst_8 = arith.constant dense<0.000000e+00> : vector<8xf32>
    %15 = vector.multi_reduction <add>, %14, %cst_8 [1] : vector<8x32xf32> to vector<8xf32>
    %16 = vector.shape_cast %15 : vector<8xf32> to vector<8x1xf32>
    %cst_9 = arith.constant 3.200000e+01 : f32
    %17 = vector.broadcast %cst_9 : f32 to vector<8x1xf32>
    %18 = arith.divf %16, %17 : vector<8x1xf32>
    %19 = arith.mulf %14, %14 : vector<8x32xf32>
    %cst_10 = arith.constant dense<0.000000e+00> : vector<8xf32>
    %20 = vector.multi_reduction <add>, %19, %cst_10 [1] : vector<8x32xf32> to vector<8xf32>
    %21 = vector.shape_cast %20 : vector<8xf32> to vector<8x1xf32>
    %cst_11 = arith.constant 3.200000e+01 : f32
    %22 = vector.broadcast %cst_11 : f32 to vector<8x1xf32>
    %23 = arith.divf %21, %22 : vector<8x1xf32>
    %24 = arith.mulf %18, %18 : vector<8x1xf32>
    %25 = arith.subf %23, %24 : vector<8x1xf32>
    %cst_12 = arith.constant 0.000000e+00 : f32
    %26 = vector.broadcast %cst_12 : f32 to vector<8x1xf32>
    %27 = arith.maximumf %25, %26 : vector<8x1xf32>
    %cst_13 = arith.constant 9.99999974E-6 : f32
    %28 = vector.broadcast %cst_13 : f32 to vector<8x1xf32>
    %29 = arith.addf %27, %28 : vector<8x1xf32>
    %30 = math.rsqrt %29 : vector<8x1xf32>
    %31 = vector.broadcast %18 : vector<8x1xf32> to vector<8x32xf32>
    %32 = arith.subf %14, %31 : vector<8x32xf32>
    %33 = vector.broadcast %30 : vector<8x1xf32> to vector<8x32xf32>
    %34 = arith.mulf %32, %33 : vector<8x32xf32>
    %35 = vector.extract_strided_slice %3 {offsets = [1, 0], sizes = [1, 32], strides = [1, 1]} : vector<3x32xf32> to vector<1x32xf32>
    %36 = vector.broadcast %35 : vector<1x32xf32> to vector<8x32xf32>
    %37 = arith.mulf %34, %36 : vector<8x32xf32>
    %38 = vector.extract_strided_slice %3 {offsets = [2, 0], sizes = [1, 32], strides = [1, 1]} : vector<3x32xf32> to vector<1x32xf32>
    %39 = vector.broadcast %38 : vector<1x32xf32> to vector<8x32xf32>
    %40 = arith.addf %37, %39 : vector<8x32xf32>
    %c0_14 = arith.constant 0 : index
    %c0_15 = arith.constant 0 : index
    %41 = vector.load %arg4[%c0_14, %c0_15] : memref<8x32xf32, #tpu.memory_space<vmem>>, vector<8x32xf32>
    tpu.vector_store %arg4[%c0_14, %c0_15], %40 {strides = array<i32>} : memref<8x32xf32, #tpu.memory_space<vmem>>, vector<8x32xf32>,
    return
  }
  func.func @transform_0(%arg0: i32) -> (i32, i32) {
    %c0_i32 = arith.constant 0 : i32
    %c0_i32_0 = arith.constant 0 : i32
    return %arg0, %c0_i32 : i32, i32
  }
  func.func @transform_1(%arg0: i32) -> (i32, i32) {
    %c0_i32 = arith.constant 0 : i32
    %c0_i32_0 = arith.constant 0 : i32
    %c0_i32_1 = arith.constant 0 : i32
    return %c0_i32, %c0_i32_0 : i32, i32
  }
  func.func @transform_2(%arg0: i32) -> (i32, i32) {
    %c0_i32 = arith.constant 0 : i32
    %c0_i32_0 = arith.constant 0 : i32
    %c0_i32_1 = arith.constant 0 : i32
    return %c0_i32, %c0_i32_0 : i32, i32
  }
  func.func @transform_3(%arg0: i32) -> (i32, i32) {
    %c0_i32 = arith.constant 0 : i32
    %c0_i32_0 = arith.constant 0 : i32
    return %arg0, %c0_i32 : i32, i32
  }
}

module attributes {stable_mosaic.version = 11 : i64} {
  func.func @_mlm_head_resident_kernel(%arg0: i32, %arg1: memref<8x32xf32, #tpu.memory_space<vmem>>, %arg2: memref<32x32xf32, #tpu.memory_space<vmem>>, %arg3: memref<3x32xf32, #tpu.memory_space<vmem>>, %arg4: memref<8x32xf32, #tpu.memory_space<vmem>>) attributes {dimension_semantics = [#tpu.dimension_semantics<parallel>], iteration_bounds = array<i64: 2>, scalar_prefetch = 0 : i64, scratch_operands = 0 : i64, tpu.core_type = #tpu.core_type<tc>, window_params = [{transform_indices = @transform_0, window_bounds = array<i64: 8, 32>}, {pipeline_mode = #tpu.pipeline_mode<synchronous>, transform_indices = @transform_1, window_bounds = array<i64: 32, 32>}, {pipeline_mode = #tpu.pipeline_mode<synchronous>, transform_indices = @transform_2, window_bounds = array<i64: 3, 32>}, {transform_indices = @transform_3, window_bounds = array<i64: 8, 32>}]} {
    %c0 = arith.constant 0 : index
    %c0_0 = arith.constant 0 : index
    %0 = vector.load %arg1[%c0, %c0_0] : memref<8x32xf32, #tpu.memory_space<vmem>>, vector<8x32xf32>
    %c0_1 = arith.constant 0 : index
    %c0_2 = arith.constant 0 : index
    %1 = vector.load %arg2[%c0_1, %c0_2] : memref<32x32xf32, #tpu.memory_space<vmem>>, vector<32x32xf32>
    %cst = arith.constant dense<0.000000e+00> : vector<8x32xf32>
    %2 = tpu.matmul %0, %1, %cst {dimension_numbers = #tpu.dot_dimension_numbers<[1], [1], [0], [0], [0, 0, 1, 0], [], []>} : vector<8x32xf32>, vector<32x32xf32>, vector<8x32xf32> -> vector<8x32xf32>
    %c0_3 = arith.constant 0 : index
    %c0_4 = arith.constant 0 : index
    %3 = vector.load %arg3[%c0_3, %c0_4] : memref<3x32xf32, #tpu.memory_space<vmem>>, vector<3x32xf32>
    %4 = vector.extract_strided_slice %3 {offsets = [0, 0], sizes = [1, 32], strides = [1, 1]} : vector<3x32xf32> to vector<1x32xf32>
    %5 = vector.broadcast %4 : vector<1x32xf32> to vector<8x32xf32>
    %6 = arith.addf %2, %5 : vector<8x32xf32>
    %cst_5 = arith.constant 5.000000e-01 : f32
    %7 = vector.broadcast %cst_5 : f32 to vector<8x32xf32>
    %8 = arith.mulf %7, %6 : vector<8x32xf32>
    %cst_6 = arith.constant 0.707106769 : f32
    %9 = vector.broadcast %cst_6 : f32 to vector<8x32xf32>
    %10 = arith.mulf %6, %9 : vector<8x32xf32>
    %11 = math.erf %10 : vector<8x32xf32>
    %cst_7 = arith.constant 1.000000e+00 : f32
    %12 = vector.broadcast %cst_7 : f32 to vector<8x32xf32>
    %13 = arith.addf %12, %11 : vector<8x32xf32>
    %14 = arith.mulf %8, %13 : vector<8x32xf32>
    %cst_8 = arith.constant dense<0.000000e+00> : vector<8xf32>
    %15 = vector.multi_reduction <add>, %14, %cst_8 [1] : vector<8x32xf32> to vector<8xf32>
    %16 = vector.shape_cast %15 : vector<8xf32> to vector<8x1xf32>
    %cst_9 = arith.constant 3.200000e+01 : f32
    %17 = vector.broadcast %cst_9 : f32 to vector<8x1xf32>
    %18 = arith.divf %16, %17 : vector<8x1xf32>
    %19 = arith.mulf %14, %14 : vector<8x32xf32>
    %cst_10 = arith.constant dense<0.000000e+00> : vector<8xf32>
    %20 = vector.multi_reduction <add>, %19, %cst_10 [1] : vector<8x32xf32> to vector<8xf32>
    %21 = vector.shape_cast %20 : vector<8xf32> to vector<8x1xf32>
    %cst_11 = arith.constant 3.200000e+01 : f32
    %22 = vector.broadcast %cst_11 : f32 to vector<8x1xf32>
    %23 = arith.divf %21, %22 : vector<8x1xf32>
    %24 = arith.mulf %18, %18 : vector<8x1xf32>
    %25 = arith.subf %23, %24 : vector<8x1xf32>
    %cst_12 = arith.constant 0.000000e+00 : f32
    %26 = vector.broadcast %cst_12 : f32 to vector<8x1xf32>
    %27 = arith.maximumf %25, %26 : vector<8x1xf32>
    %cst_13 = arith.constant 9.99999974E-6 : f32
    %28 = vector.broadcast %cst_13 : f32 to vector<8x1xf32>
    %29 = arith.addf %27, %28 : vector<8x1xf32>
    %30 = math.rsqrt %29 : vector<8x1xf32>
    %31 = vector.broadcast %18 : vector<8x1xf32> to vector<8x32xf32>
    %32 = arith.subf %14, %31 : vector<8x32xf32>
    %33 = vector.broadcast %30 : vector<8x1xf32> to vector<8x32xf32>
    %34 = arith.mulf %32, %33 : vector<8x32xf32>
    %35 = vector.extract_strided_slice %3 {offsets = [1, 0], sizes = [1, 32], strides = [1, 1]} : vector<3x32xf32> to vector<1x32xf32>
    %36 = vector.broadcast %35 : vector<1x32xf32> to vector<8x32xf32>
    %37 = arith.mulf %34, %36 : vector<8x32xf32>
    %38 = vector.extract_strided_slice %3 {offsets = [2, 0], sizes = [1, 32], strides = [1, 1]} : vector<3x32xf32> to vector<1x32xf32>
    %39 = vector.broadcast %38 : vector<1x32xf32> to vector<8x32xf32>
    %40 = arith.addf %37, %39 : vector<8x32xf32>
    %c0_14 = arith.constant 0 : index
    %c0_15 = arith.constant 0 : index
    %41 = vector.load %arg4[%c0_14, %c0_15] : memref<8x32xf32, #tpu.memory_space<vmem>>, vector<8x32xf32>
    tpu.vector_store %arg4[%c0_14, %c0_15], %40 {strides = array<i32>} : memref<8x32xf32, #tpu.memory_space<vmem>>, vector<8x32xf32>,
    return
  }
  func.func @transform_0(%arg0: i32) -> (i32, i32) {
    %c0_i32 = arith.constant 0 : i32
    %c0_i32_0 = arith.constant 0 : i32
    return %arg0, %c0_i32 : i32, i32
  }
  func.func @transform_1(%arg0: i32) -> (i32, i32) {
    %c0_i32 = arith.constant 0 : i32
    %c0_i32_0 = arith.constant 0 : i32
    %c0_i32_1 = arith.constant 0 : i32
    return %c0_i32, %c0_i32_0 : i32, i32
  }
  func.func @transform_2(%arg0: i32) -> (i32, i32) {
    %c0_i32 = arith.constant 0 : i32
    %c0_i32_0 = arith.constant 0 : i32
    %c0_i32_1 = arith.constant 0 : i32
    return %c0_i32, %c0_i32_0 : i32, i32
  }
  func.func @transform_3(%arg0: i32) -> (i32, i32) {
    %c0_i32 = arith.constant 0 : i32
    %c0_i32_0 = arith.constant 0 : i32
    return %arg0, %c0_i32 : i32, i32
  }
}

</mosaic_0001>

<bundles_post_ra>
// kernel: tpu_custom_call.1
= control target key start
LH: loop header
LB: loop body
LE: loop exit
PB: predicated region body
PF: predicated region fallthrough
CT: control target
= control target key end

     0   :  { %8 = vsyncpa [#allocation3], 0  ;;  %s895_s0 = inlined_call_operand.hbm [shape: f32[16,32], index: 0, kind: input, shape index: {}]   ;;  %s896_s1 = inlined_call_operand.hbm [shape: f32[32,32], index: 1, kind: input, shape index: {}]   ;;  %s897_s2 = inlined_call_operand.hbm [shape: f32[3,32], index: 2, kind: input, shape index: {}]   ;;  %s898_s3 = inlined_call_operand.hbm [shape: f32[16,32], index: 3, kind: output, shape index: {}]  }
   0x1   :  { %10 = vsyncpa [#allocation3 + $0x1], 0 }
   0x2   :  { %11 = vsyncpa [#allocation6], 0 }
   0x3   :  { %12 = vsyncpa [#allocation4], 0 }
   0x4   :  { %14 = vsyncpa [#allocation4 + $0x1], 0  ;;  %s733_s12 = smov 0   ;;  %s735_s13 = smov 0  }
   0x5   :  { %s737_s14 = smov 0   ;;  %s739_s15 = smov 0  }
   0x6 LB: > { %s130_s18 = sshll.u32 %s896_s1, 4  ;;  %s757_s19 = sadd.s32 4294967295, %s706_s15   ;;  %s706_s15 = sphi %s739_s15, %s909_s15   ;;  %s702_s14 = sphi %s737_s14, %s908_s14   ;;  %s698_s13 = sphi %s735_s13, %s907_s13   ;;  %s694_s12 = sphi %s733_s12, %s906_s12   ;;  %s131_s18 = int_to_ptr.hbm [resolvable:$true] %s130_s18 }
   0x7   : > { %p449_p0 = scmp.ge.s32.totalorder %s706_s15, 1  ;;  %p41_p1 = scmp.eq.s32.totalorder %s757_s19, 0 }
   0x8   : > { %p119_p2 = scmp.lt.s32.totalorder %s706_s15, 3  ;;  %s708_s21 = smov [#allocation5]  }
   0x9   : > { %s132_s22 = sshll.u32 %s708_s21, 4  ;;  %s145_s25 = sshll.u32 %s897_s2, 4  ;;  %s133_s22 = int_to_ptr.vmem [resolvable:$true] %s132_s22  ;;  %s146_s25 = int_to_ptr.hbm [resolvable:$true] %s145_s25 }
   0xa   : > { %p762_p3 = pnand %p449_p0, %p119_p2  ;;  %s709_s26 = smov [#allocation7]  }
   0xb   : > { %s147_s27 = sshll.u32 %s709_s26, 4  ;;  %s710_s28 = smov 128   ;;  %s148_s27 = int_to_ptr.vmem [resolvable:$true] %s147_s27 }
   0xc   : > { %p482_p4 = pneg %p762_p3  ;;  %s711_s29 = smov 8  }
   0xd   : > { %s448_s30 = sadd.s32 4294967294, %s706_s15   ;;  %s776_s4 = sadd.s32 1, %s706_s15  }
   0xe   : > { %p483_p6 = pnand %p482_p4, %p41_p1  ;;  %s24_s5 = ssub.s32 %s706_s15, %s776_s4 }
   0xf   : > { %s27_s6 = sadd.s32 1, %s702_s14  ;;  %p25_p7 = scmp.eq.s32.totalorder %s24_s5, 0 }
  0x10   : > { %485 = dma.hbm_to_vmem [thread:$0]  (!%p483_p6), %s131_s18, 512, %s133_s22, [#allocation6], %s710_s28, %s710_s28, %s711_s29  }
  0x11   : > { %488 = dma.hbm_to_vmem [thread:$0]  (!%p483_p6), %s146_s25, 64, %s148_s27, [#allocation6]  }
  0x12   : > { %p34_p8 = scmp.ne.s32.totalorder %s702_s14, %s698_s13  ;;  %p35_p9 = scmp.eq.s32.totalorder %s706_s15, 0 }
  0x13   : > { %p40_p10 = scmp.ne.s32.totalorder %s698_s13, %s694_s12  ;;  %p106_p13 = scmp.eq.s32.totalorder %s757_s19, 1 }
  0x14   : > { %s787_s7 = scalar_select %p25_p7, %s702_s14, %s27_s6  }
  0x15   : > { %p789_p11 = por %p35_p9, %p34_p8  ;;  %p795_p12 = por %p41_p1, %p40_p10 }
  0x16   : > { %p112_p0 = scmp.eq.s32.totalorder %s448_s30, 1  ;;  %p499_p2 = scmp.lt.s32.totalorder %s706_s15, 2 }
  0x17   : > { %s158_s10 = sand.u32 1, %s702_s14   ;;  %p802_p4 = por %p106_p13, %p34_p8 }
  0x18   : > { %p806_p6 = por %p112_p0, %p40_p10  ;;  %s453_s17 = sshll.u32 %s158_s10, 3 }
  0x19   : > { %s454_s18 = sshll.u32 %s706_s15, 3  ;;  %s162_s24 = scalar_lea.vmem [#allocation2], %s453_s17 }
  0x1a   : > { %s166_s23 = scalar_lea.hbm %s895_s0, %s454_s18  ;;  %s170_s25 = sshll.u32 %s162_s24, 4  ;;  %s171_s25 = int_to_ptr.vmem [resolvable:$true] %s170_s25 }
  0x1b   : > { %s168_s26 = sshll.u32 %s166_s23, 4  ;;  %p816_p7 = pnand %p499_p2, %p789_p11  ;;  %s169_s26 = int_to_ptr.hbm [resolvable:$true] %s168_s26 }
  0x1c   : > { %s159_s28 = scalar_lea.sflag [#allocation3], %s158_s10  ;;  %s606_s29 = sshra.s32 %s169_s26, 4  ;;  %s607_s29 = int_to_ptr.hbm [resolvable:$true] %s606_s29 }
  0x1d   : > { %s608_s30 = scalar_lea.hbm %s607_s29, 8  ;;  %p610_p9 = pneg %p816_p7 }
  0x1e   : > { %p609_p8 = scmp.ne.s32.totalorder %s607_s29, %s608_s30  ;;  %s613_s17 = scalar_lea.hbm %s895_s0, 16 }
  0x1f   : > { %p614_p11 = scmp.lt.s32.totalorder %s607_s29, %s895_s0  ;;  %p615_p0 = scmp.lt.s32.totalorder %s613_s17, %s608_s30 }
  0x20   : > { %p611_p10 = pnand %p610_p9, %p609_p8 }
  0x21   : > { %p616_p2 = por %p615_p0, %p614_p11 }
  0x22   : > { %p612_p13 = pneg %p611_p10 }
  0x24   : > { %p617_p5 = pnand %p616_p2, %p612_p13 }
  0x26   : > { %620 = shalt.err (!%p617_p5)
}
  0x27   : > { %492 = dma.hbm_to_vmem [thread:$0]  (!%p816_p7), %s169_s26, 128, %s171_s25, %s159_s28  }
  0x28   : > { %179 = sbr.rel (%p762_p3) target bundleno = 403 (0x193), region = 32  ;;  %s833_s10 = sand.u32 (!%p762_p3), 1, %s698_s13  }
  0x29   : > { %s456_s21 = sshll.u32 (!%p762_p3), %s833_s10, 3  ;;  %s182_s22 = scalar_lea.sflag (!%p762_p3), [#allocation3], %s833_s10 }
  0x2a   : > { %s185_s23 = scalar_lea.vmem (!%p762_p3), [#allocation2], %s456_s21 }
  0x2d   : > { %681 = dma.done.wait (%p795_p12), %s182_s22, 128  }
  0x2e   : > { %683 = vsyncadd (%p795_p12), %s182_s22, 4294967168 }
  0x2f   : > { %685 = dma.done.wait (%p41_p1), [#allocation6], 576  }
  0x30   : > { %687 = vsyncadd (%p41_p1), [#allocation6], 4294966720  ;;  %vm226_vm0 = vcmask 261120   ;;  %v223_v0 = vld [vmem:[#allocation5 + $0x18] sm:$0xff]  ;;  %v222_v1 = vld [vmem:[#allocation5 + $0x10] sm:$0xff]  ;;  %v712_v51 = vmov 32.0  }
  0x31   : > { %460 = vmatpush.xpose.msk.msra.mxu0 %vm226_vm0, %v223_v0  ;;  %v221_v2 = vld [vmem:[#allocation5 + $0x8] sm:$0xff]  ;;  %v220_v3 = vld [vmem:[#allocation5] sm:$0xff]  ;;  %v219_v4 = vld [vmem:[%s185_s23] sm:$0xff]  ;;  %s467_s20 = sshll.u32 %s757_s19, 3  ;;  %s218_s26 = scalar_lea.vmem [#allocation8], %s456_s21 }
  0x32   : > { %v852_v5 = vld [vmem:[#allocation7] sm:$0x7]  ;;  %s354_s25 = scalar_lea.hbm %s898_s3, %s467_s20  ;;  %s356_s27 = sshll.u32 %s218_s26, 4  ;;  %s357_s27 = int_to_ptr.vmem [resolvable:$true] %s356_s27 }
  0x33   : > { %v225_v6 = vperm.slane %v852_v5, 0  ;;  %s358_s19 = sshll.u32 %s354_s25, 4  ;;  %s344_s28 = scalar_lea.sflag [#allocation4], %s833_s10  ;;  %s359_s19 = int_to_ptr.hbm [resolvable:$true] %s358_s19 }
  0x34   : > { %s650_s29 = sshra.s32 %s359_s19, 4  ;;  %s656_s17 = scalar_lea.hbm %s898_s3, 16  ;;  %s651_s29 = int_to_ptr.hbm [resolvable:$true] %s650_s29 }
  0x35   : > { %461 = vmatpush.xpose.msk.msra.mxu0 %vm226_vm0, %v222_v1  ;;  %s652_s30 = scalar_lea.hbm %s651_s29, 8  ;;  %p657_p12 = scmp.lt.s32.totalorder %s651_s29, %s898_s3 }
  0x36   : > { %p653_p1 = scmp.ne.s32.totalorder %s651_s29, %s652_s30  ;;  %p658_p7 = scmp.lt.s32.totalorder %s656_s17, %s652_s30 }
  0x38   : > { %p654_p3 = pnand %p653_p1, %p802_p4  ;;  %p659_p8 = por %p658_p7, %p657_p12 }
  0x39   : > { %462 = vmatpush.xpose.msk.msra.mxu0 %vm226_vm0, %v221_v2 }
  0x3a   : > { %p655_p5 = pneg %p654_p3 }
  0x3c   : > { %p660_p9 = pnand %p659_p8, %p655_p5 }
  0x3d   : > { %463 = vmatpush.xpose.msk.msra.mxu0 %vm226_vm0, %v220_v3 }
  0x40   : > { %464 = vmatmul.msk.f32.vlgmr.msra.gmra.mxu0 %vm226_vm0, %v219_v4 }
  0xbd   : > { %v259_v7 = vpop.f32.mrf.mxu0 }
  0xbe   : > { %v260_v8 = vadd.f32 %v259_v7, %v225_v6 }
  0xc0   : > { %v263_v9 = vmul.f32 0.70710677, %v260_v8  ;;  %v262_v45 = vmul.f32 0.5, %v260_v8 }
  0xc2   : > { %v264_v10 = vmul.f32 %v263_v9, %v263_v9 }
  0xc4   : > { %v265_v11 = vmin.f32 %v264_v10, 16.0 }
  0xc6   : > { %v266_v12 = vmul.f32 2.1237322e-06, %v265_v11  ;;  %v277_v13 = vmul.f32 3.8918573e-05, %v265_v11 }
  0xc8   : > { %v267_v14 = vadd.f32 0.00028619796, %v266_v12  ;;  %v278_v15 = vadd.f32 0.001143296, %v277_v13  ;;  %v340_v12 = vperm.slane %v852_v5, 2 }
  0xca   : > { %v268_v16 = vmul.f32 %v267_v14, %v265_v11  ;;  %v279_v17 = vmul.f32 %v278_v15, %v265_v11 }
  0xcc   : > { %v280_v18 = vadd.f32 0.014752088, %v279_v17  ;;  %v269_v19 = vadd.f32 0.0036580483, %v268_v16 }
  0xce   : > { %v281_v20 = vmul.f32 %v280_v18, %v265_v11  ;;  %v270_v22 = vmul.f32 %v269_v19, %v265_v11 }
  0xd0   : > { %v282_v21 = vadd.f32 0.112945676, %v281_v20  ;;  %v271_v25 = vadd.f32 0.05243302, %v270_v22 }
  0xd2   : > { %v283_v23 = vmul.f32 %v282_v21, %v265_v11  ;;  %v272_v28 = vmul.f32 %v271_v25, %v265_v11 }
  0xd4   : > { %v284_v24 = vadd.f32 0.4994258, %v283_v23  ;;  %v273_v29 = vadd.f32 0.18741608, %v272_v28 }
  0xd6   : > { %v285_v26 = vmul.f32 %v284_v24, %v265_v11  ;;  %v274_v31 = vmul.f32 %v273_v29, %v265_v11 }
  0xd8   : > { %v286_v27 = vadd.f32 1.0, %v285_v26  ;;  %v275_v35 = vadd.f32 1.1283791, %v274_v31 }
  0xda   : > { %540 = vrcp.f32 %v286_v27  ;;  %v298_v34 = vand.u32 2147483648, %v286_v27  ;;  %v296_v37 = vand.u32 2147483647, %v286_v27  ;;  %vm292_vm2 = vweird.f32 %v286_v27 }
  0xdb   : > { %v276_v40 = vmul.f32 %v275_v35, %v263_v9  ;;  %542 = vrcp.f32 %v712_v51  ;;  %v338_v9 = vperm.slane %v852_v5, 1 }
  0xdc   : > { %v299_v39 = vor.u32 1.1754944e-38, %v298_v34  ;;  %vm297_vm4 = vcmp.eq.f32.partialorder %v296_v37, 8.507059e+37 }
  0xe0   : > { %v541_v30 = vpop.eup %540 }
  0xe1   : > { %v288_v32 = vmul.f32 %v541_v30, %v286_v27  ;;  %vm293_vm1 = vweird.f32 %v541_v30  ;;  %v543_v52 = vpop.eup %542 }
  0xe2   : > { %vm294_vm3 = vmor %vm292_vm2, %vm293_vm1  ;;  %v310_v53 = vmul.f32 32.0, %v543_v52  ;;  %vm314_vm5 = vweird.f32 %v543_v52 }
  0xe3   : > { %v289_v33 = vsub.f32 1.0, %v288_v32 }
  0xe4   : > { %v311_v54 = vsub.f32 1.0, %v310_v53 }
  0xe5   : > { %v290_v36 = vmul.f32 %v541_v30, %v289_v33 }
  0xe6   : > { %v312_v55 = vmul.f32 %v543_v52, %v311_v54 }
  0xe7   : > { %v291_v38 = vadd.f32 %v541_v30, %v290_v36 }
  0xe8   : > { %v313_v56 = vadd.f32 %v543_v52, %v312_v55 }
  0xe9   : > { %v295_v41 = vsel %vm294_vm3, %v541_v30, %v291_v38 }
  0xea   : > { %v300_v42 = vsel %vm297_vm4, %v299_v39, %v295_v41  ;;  %v315_v58 = vsel %vm314_vm5, %v543_v52, %v313_v56 }
  0xeb   : > { %v301_v43 = vmul.f32 %v300_v42, %v276_v40 }
  0xed   : > { %v465_v44 = vclamps-f32 %v301_v43, 1.0 }
  0xef   : > { %v304_v46 = vadd.f32 1.0, %v465_v44 }
  0xf1   : > { %v305_v47 = vmul.f32 %v304_v46, %v262_v45 }
  0xf3   : > { %v306_v48 = vsel %vm226_vm0, %v305_v47, 0.0  ;;  %v317_v49 = vmul.f32 %v305_v47, %v305_v47 }
  0xf4   : > { %307 = vadd.xlane.f32.xlu0 %v306_v48 }
  0xf5   : > { %v318_v50 = vsel %vm226_vm0, %v317_v49, 0.0 }
  0xfc   : > { %319 = vadd.xlane.f32.xlu0 %v318_v50 }
 0x167   : > { %v308_v57 = vpop.xlane.xlu0 %307 }
 0x168   : > { %v316_v59 = vmul.f32 %v315_v58, %v308_v57 }
 0x16a   : > { %v322_v61 = vmul.f32 %v316_v59, %v316_v59  ;;  %v336_v10 = vsub.f32 %v305_v47, %v316_v59 }
 0x16f   : > { %v320_v60 = vpop.xlane.xlu0 %319 }
 0x170   : > { %v321_v62 = vmul.f32 %v320_v60, %v315_v58 }
 0x172   : > { %v323_v63 = vsub.f32 %v321_v62, %v322_v61 }
 0x174   : > { %v324_v0 = vmax.f32 %v323_v63, 0.0 }
 0x176   : > { %v325_v1 = vadd.f32 1e-05, %v324_v0 }
 0x178   : > { %544 = vrsqrt.f32 %v325_v1  ;;  %vm332_vm7 = vweird.f32 %v325_v1 }
 0x17e   : > { %v545_v2 = vpop.eup %544 }
 0x17f   : > { %v327_v3 = vmul.f32 %v545_v2, %v325_v1  ;;  %vm333_vm6 = vweird.f32 %v545_v2 }
 0x180   : > { %vm334_vm8 = vmor %vm332_vm7, %vm333_vm6 }
 0x181   : > { %v328_v4 = vmul.f32 %v545_v2, %v327_v3 }
 0x183   : > { %v329_v6 = vmul.f32 0.5, %v328_v4 }
 0x185   : > { %v330_v7 = vsub.f32 1.5, %v329_v6 }
 0x187   : > { %v331_v8 = vmul.f32 %v545_v2, %v330_v7 }
 0x189   : > { %v335_v11 = vsel %vm334_vm8, %v545_v2, %v331_v8 }
 0x18a   : > { %v337_v13 = vmul.f32 %v336_v10, %v335_v11 }
 0x18c   : > { %v339_v14 = vmul.f32 %v338_v9, %v337_v13 }
 0x18e   : > { %v341_v15 = vadd.f32 %v340_v12, %v339_v14 }
 0x190   : > { %342 = vst.msk [vmem:[%s218_s26] sm:$0xff] %vm226_vm0, %v341_v15 }
 0x191   : > { %663 = shalt.err (!%p660_p9)
}
 0x192   : > { %480 = dma.vmem_to_hbm [thread:$0]  (%p802_p4), %s357_s27, 128, %s359_s19, %s344_s28  }
 0x193 PF: > { %s370_s10 = sand.u32 1, %s694_s12   ;;  %p905_p10 = scmp.ge.s32.totalorder %s706_s15, 2 }
 0x194   : > { %s371_s21 = scalar_lea.sflag [#allocation4], %s370_s10 }
 0x195   : > { %p494_p13 = pnand %p905_p10, %p806_p6 }
 0x197   : > { %p495_p11 = pneg %p494_p13 }
 0x199   : > { %689 = dma.done.wait (%p495_p11), %s371_s21, 128  }
 0x19a   : > { %691 = vsyncadd (%p495_p11), %s371_s21, 4294967168  ;;  %p17_p0 = scmp.ge.s32.totalorder %s776_s4, 4   ;;  %s906_s12 = smov %s698_s13 }
 0x19b   : > { %s907_s13 = smov %s702_s14  ;;  %s908_s14 = smov %s787_s7 }
 0x19c   : > { %s909_s15 = smov %s776_s4  ;;  %19 = sbr.rel (!%p17_p0) target bundleno = 6 (0x6), region = 85 }
 0x1a1   :  { %377 = vsyncpa [#allocation3], 1 }
 0x1a2   :  { %379 = vsyncpa [#allocation3 + $0x1], 1 }
 0x1a3   :  { %380 = vsyncpa [#allocation6], 1 }
 0x1a4   :  { %381 = vsyncpa [#allocation4], 1 }
 0x1a5   :  { %383 = vsyncpa [#allocation4 + $0x1], 1 }

// kernel: tpu_custom_call.1
= control target key start
LH: loop header
LB: loop body
LE: loop exit
PB: predicated region body
PF: predicated region fallthrough
CT: control target
= control target key end

     0   :  { %8 = vsyncpa [#allocation3], 0  ;;  %s895_s0 = inlined_call_operand.hbm [shape: f32[16,32], index: 0, kind: input, shape index: {}]   ;;  %s896_s1 = inlined_call_operand.hbm [shape: f32[32,32], index: 1, kind: input, shape index: {}]   ;;  %s897_s2 = inlined_call_operand.hbm [shape: f32[3,32], index: 2, kind: input, shape index: {}]   ;;  %s898_s3 = inlined_call_operand.hbm [shape: f32[16,32], index: 3, kind: output, shape index: {}]  }
   0x1   :  { %10 = vsyncpa [#allocation3 + $0x1], 0 }
   0x2   :  { %11 = vsyncpa [#allocation6], 0 }
   0x3   :  { %12 = vsyncpa [#allocation4], 0 }
   0x4   :  { %14 = vsyncpa [#allocation4 + $0x1], 0  ;;  %s733_s12 = smov 0   ;;  %s735_s13 = smov 0  }
   0x5   :  { %s737_s14 = smov 0   ;;  %s739_s15 = smov 0  }
   0x6 LB: > { %s130_s18 = sshll.u32 %s896_s1, 4  ;;  %s757_s19 = sadd.s32 4294967295, %s706_s15   ;;  %s706_s15 = sphi %s739_s15, %s909_s15   ;;  %s702_s14 = sphi %s737_s14, %s908_s14   ;;  %s698_s13 = sphi %s735_s13, %s907_s13   ;;  %s694_s12 = sphi %s733_s12, %s906_s12   ;;  %s131_s18 = int_to_ptr.hbm [resolvable:$true] %s130_s18 }
   0x7   : > { %p449_p0 = scmp.ge.s32.totalorder %s706_s15, 1  ;;  %p41_p1 = scmp.eq.s32.totalorder %s757_s19, 0 }
   0x8   : > { %p119_p2 = scmp.lt.s32.totalorder %s706_s15, 3  ;;  %s708_s21 = smov [#allocation5]  }
   0x9   : > { %s132_s22 = sshll.u32 %s708_s21, 4  ;;  %s145_s25 = sshll.u32 %s897_s2, 4  ;;  %s133_s22 = int_to_ptr.vmem [resolvable:$true] %s132_s22  ;;  %s146_s25 = int_to_ptr.hbm [resolvable:$true] %s145_s25 }
   0xa   : > { %p762_p3 = pnand %p449_p0, %p119_p2  ;;  %s709_s26 = smov [#allocation7]  }
   0xb   : > { %s147_s27 = sshll.u32 %s709_s26, 4  ;;  %s710_s28 = smov 128   ;;  %s148_s27 = int_to_ptr.vmem [resolvable:$true] %s147_s27 }
   0xc   : > { %p482_p4 = pneg %p762_p3  ;;  %s711_s29 = smov 8  }
   0xd   : > { %s448_s30 = sadd.s32 4294967294, %s706_s15   ;;  %s776_s4 = sadd.s32 1, %s706_s15  }
   0xe   : > { %p483_p6 = pnand %p482_p4, %p41_p1  ;;  %s24_s5 = ssub.s32 %s706_s15, %s776_s4 }
   0xf   : > { %s27_s6 = sadd.s32 1, %s702_s14  ;;  %p25_p7 = scmp.eq.s32.totalorder %s24_s5, 0 }
  0x10   : > { %485 = dma.hbm_to_vmem [thread:$0]  (!%p483_p6), %s131_s18, 512, %s133_s22, [#allocation6], %s710_s28, %s710_s28, %s711_s29  }
  0x11   : > { %488 = dma.hbm_to_vmem [thread:$0]  (!%p483_p6), %s146_s25, 64, %s148_s27, [#allocation6]  }
  0x12   : > { %p34_p8 = scmp.ne.s32.totalorder %s702_s14, %s698_s13  ;;  %p35_p9 = scmp.eq.s32.totalorder %s706_s15, 0 }
  0x13   : > { %p40_p10 = scmp.ne.s32.totalorder %s698_s13, %s694_s12  ;;  %p106_p13 = scmp.eq.s32.totalorder %s757_s19, 1 }
  0x14   : > { %s787_s7 = scalar_select %p25_p7, %s702_s14, %s27_s6  }
  0x15   : > { %p789_p11 = por %p35_p9, %p34_p8  ;;  %p795_p12 = por %p41_p1, %p40_p10 }
  0x16   : > { %p112_p0 = scmp.eq.s32.totalorder %s448_s30, 1  ;;  %p499_p2 = scmp.lt.s32.totalorder %s706_s15, 2 }
  0x17   : > { %s158_s10 = sand.u32 1, %s702_s14   ;;  %p802_p4 = por %p106_p13, %p34_p8 }
  0x18   : > { %p806_p6 = por %p112_p0, %p40_p10  ;;  %s453_s17 = sshll.u32 %s158_s10, 3 }
  0x19   : > { %s454_s18 = sshll.u32 %s706_s15, 3  ;;  %s162_s24 = scalar_lea.vmem [#allocation2], %s453_s17 }
  0x1a   : > { %s166_s23 = scalar_lea.hbm %s895_s0, %s454_s18  ;;  %s170_s25 = sshll.u32 %s162_s24, 4  ;;  %s171_s25 = int_to_ptr.vmem [resolvable:$true] %s170_s25 }
  0x1b   : > { %s168_s26 = sshll.u32 %s166_s23, 4  ;;  %p816_p7 = pnand %p499_p2, %p789_p11  ;;  %s169_s26 = int_to_ptr.hbm [resolvable:$true] %s168_s26 }
  0x1c   : > { %s159_s28 = scalar_lea.sflag [#allocation3], %s158_s10  ;;  %s606_s29 = sshra.s32 %s169_s26, 4  ;;  %s607_s29 = int_to_ptr.hbm [resolvable:$true] %s606_s29 }
  0x1d   : > { %s608_s30 = scalar_lea.hbm %s607_s29, 8  ;;  %p610_p9 = pneg %p816_p7 }
  0x1e   : > { %p609_p8 = scmp.ne.s32.totalorder %s607_s29, %s608_s30  ;;  %s613_s17 = scalar_lea.hbm %s895_s0, 16 }
  0x1f   : > { %p614_p11 = scmp.lt.s32.totalorder %s607_s29, %s895_s0  ;;  %p615_p0 = scmp.lt.s32.totalorder %s613_s17, %s608_s30 }
  0x20   : > { %p611_p10 = pnand %p610_p9, %p609_p8 }
  0x21   : > { %p616_p2 = por %p615_p0, %p614_p11 }
  0x22   : > { %p612_p13 = pneg %p611_p10 }
  0x24   : > { %p617_p5 = pnand %p616_p2, %p612_p13 }
  0x26   : > { %620 = shalt.err (!%p617_p5)
}
  0x27   : > { %492 = dma.hbm_to_vmem [thread:$0]  (!%p816_p7), %s169_s26, 128, %s171_s25, %s159_s28  }
  0x28   : > { %179 = sbr.rel (%p762_p3) target bundleno = 403 (0x193), region = 32  ;;  %s833_s10 = sand.u32 (!%p762_p3), 1, %s698_s13  }
  0x29   : > { %s456_s21 = sshll.u32 (!%p762_p3), %s833_s10, 3  ;;  %s182_s22 = scalar_lea.sflag (!%p762_p3), [#allocation3], %s833_s10 }
  0x2a   : > { %s185_s23 = scalar_lea.vmem (!%p762_p3), [#allocation2], %s456_s21 }
  0x2d   : > { %681 = dma.done.wait (%p795_p12), %s182_s22, 128  }
  0x2e   : > { %683 = vsyncadd (%p795_p12), %s182_s22, 4294967168 }
  0x2f   : > { %685 = dma.done.wait (%p41_p1), [#allocation6], 576  }
  0x30   : > { %687 = vsyncadd (%p41_p1), [#allocation6], 4294966720  ;;  %vm226_vm0 = vcmask 261120   ;;  %v223_v0 = vld [vmem:[#allocation5 + $0x18] sm:$0xff]  ;;  %v222_v1 = vld [vmem:[#allocation5 + $0x10] sm:$0xff]  ;;  %v712_v51 = vmov 32.0  }
  0x31   : > { %460 = vmatpush.xpose.msk.msra.mxu0 %vm226_vm0, %v223_v0  ;;  %v221_v2 = vld [vmem:[#allocation5 + $0x8] sm:$0xff]  ;;  %v220_v3 = vld [vmem:[#allocation5] sm:$0xff]  ;;  %v219_v4 = vld [vmem:[%s185_s23] sm:$0xff]  ;;  %s467_s20 = sshll.u32 %s757_s19, 3  ;;  %s218_s26 = scalar_lea.vmem [#allocation8], %s456_s21 }
  0x32   : > { %v852_v5 = vld [vmem:[#allocation7] sm:$0x7]  ;;  %s354_s25 = scalar_lea.hbm %s898_s3, %s467_s20  ;;  %s356_s27 = sshll.u32 %s218_s26, 4  ;;  %s357_s27 = int_to_ptr.vmem [resolvable:$true] %s356_s27 }
  0x33   : > { %v225_v6 = vperm.slane %v852_v5, 0  ;;  %s358_s19 = sshll.u32 %s354_s25, 4  ;;  %s344_s28 = scalar_lea.sflag [#allocation4], %s833_s10  ;;  %s359_s19 = int_to_ptr.hbm [resolvable:$true] %s358_s19 }
  0x34   : > { %s650_s29 = sshra.s32 %s359_s19, 4  ;;  %s656_s17 = scalar_lea.hbm %s898_s3, 16  ;;  %s651_s29 = int_to_ptr.hbm [resolvable:$true] %s650_s29 }
  0x35   : > { %461 = vmatpush.xpose.msk.msra.mxu0 %vm226_vm0, %v222_v1  ;;  %s652_s30 = scalar_lea.hbm %s651_s29, 8  ;;  %p657_p12 = scmp.lt.s32.totalorder %s651_s29, %s898_s3 }
  0x36   : > { %p653_p1 = scmp.ne.s32.totalorder %s651_s29, %s652_s30  ;;  %p658_p7 = scmp.lt.s32.totalorder %s656_s17, %s652_s30 }
  0x38   : > { %p654_p3 = pnand %p653_p1, %p802_p4  ;;  %p659_p8 = por %p658_p7, %p657_p12 }
  0x39   : > { %462 = vmatpush.xpose.msk.msra.mxu0 %vm226_vm0, %v221_v2 }
  0x3a   : > { %p655_p5 = pneg %p654_p3 }
  0x3c   : > { %p660_p9 = pnand %p659_p8, %p655_p5 }
  0x3d   : > { %463 = vmatpush.xpose.msk.msra.mxu0 %vm226_vm0, %v220_v3 }
  0x40   : > { %464 = vmatmul.msk.f32.vlgmr.msra.gmra.mxu0 %vm226_vm0, %v219_v4 }
  0xbd   : > { %v259_v7 = vpop.f32.mrf.mxu0 }
  0xbe   : > { %v260_v8 = vadd.f32 %v259_v7, %v225_v6 }
  0xc0   : > { %v263_v9 = vmul.f32 0.70710677, %v260_v8  ;;  %v262_v45 = vmul.f32 0.5, %v260_v8 }
  0xc2   : > { %v264_v10 = vmul.f32 %v263_v9, %v263_v9 }
  0xc4   : > { %v265_v11 = vmin.f32 %v264_v10, 16.0 }
  0xc6   : > { %v266_v12 = vmul.f32 2.1237322e-06, %v265_v11  ;;  %v277_v13 = vmul.f32 3.8918573e-05, %v265_v11 }
  0xc8   : > { %v267_v14 = vadd.f32 0.00028619796, %v266_v12  ;;  %v278_v15 = vadd.f32 0.001143296, %v277_v13  ;;  %v340_v12 = vperm.slane %v852_v5, 2 }
  0xca   : > { %v268_v16 = vmul.f32 %v267_v14, %v265_v11  ;;  %v279_v17 = vmul.f32 %v278_v15, %v265_v11 }
  0xcc   : > { %v280_v18 = vadd.f32 0.014752088, %v279_v17  ;;  %v269_v19 = vadd.f32 0.0036580483, %v268_v16 }
  0xce   : > { %v281_v20 = vmul.f32 %v280_v18, %v265_v11  ;;  %v270_v22 = vmul.f32 %v269_v19, %v265_v11 }
  0xd0   : > { %v282_v21 = vadd.f32 0.112945676, %v281_v20  ;;  %v271_v25 = vadd.f32 0.05243302, %v270_v22 }
  0xd2   : > { %v283_v23 = vmul.f32 %v282_v21, %v265_v11  ;;  %v272_v28 = vmul.f32 %v271_v25, %v265_v11 }
  0xd4   : > { %v284_v24 = vadd.f32 0.4994258, %v283_v23  ;;  %v273_v29 = vadd.f32 0.18741608, %v272_v28 }
  0xd6   : > { %v285_v26 = vmul.f32 %v284_v24, %v265_v11  ;;  %v274_v31 = vmul.f32 %v273_v29, %v265_v11 }
  0xd8   : > { %v286_v27 = vadd.f32 1.0, %v285_v26  ;;  %v275_v35 = vadd.f32 1.1283791, %v274_v31 }
  0xda   : > { %540 = vrcp.f32 %v286_v27  ;;  %v298_v34 = vand.u32 2147483648, %v286_v27  ;;  %v296_v37 = vand.u32 2147483647, %v286_v27  ;;  %vm292_vm2 = vweird.f32 %v286_v27 }
  0xdb   : > { %v276_v40 = vmul.f32 %v275_v35, %v263_v9  ;;  %542 = vrcp.f32 %v712_v51  ;;  %v338_v9 = vperm.slane %v852_v5, 1 }
  0xdc   : > { %v299_v39 = vor.u32 1.1754944e-38, %v298_v34  ;;  %vm297_vm4 = vcmp.eq.f32.partialorder %v296_v37, 8.507059e+37 }
  0xe0   : > { %v541_v30 = vpop.eup %540 }
  0xe1   : > { %v288_v32 = vmul.f32 %v541_v30, %v286_v27  ;;  %vm293_vm1 = vweird.f32 %v541_v30  ;;  %v543_v52 = vpop.eup %542 }
  0xe2   : > { %vm294_vm3 = vmor %vm292_vm2, %vm293_vm1  ;;  %v310_v53 = vmul.f32 32.0, %v543_v52  ;;  %vm314_vm5 = vweird.f32 %v543_v52 }
  0xe3   : > { %v289_v33 = vsub.f32 1.0, %v288_v32 }
  0xe4   : > { %v311_v54 = vsub.f32 1.0, %v310_v53 }
  0xe5   : > { %v290_v36 = vmul.f32 %v541_v30, %v289_v33 }
  0xe6   : > { %v312_v55 = vmul.f32 %v543_v52, %v311_v54 }
  0xe7   : > { %v291_v38 = vadd.f32 %v541_v30, %v290_v36 }
  0xe8   : > { %v313_v56 = vadd.f32 %v543_v52, %v312_v55 }
  0xe9   : > { %v295_v41 = vsel %vm294_vm3, %v541_v30, %v291_v38 }
  0xea   : > { %v300_v42 = vsel %vm297_vm4, %v299_v39, %v295_v41  ;;  %v315_v58 = vsel %vm314_vm5, %v543_v52, %v313_v56 }
  0xeb   : > { %v301_v43 = vmul.f32 %v300_v42, %v276_v40 }
  0xed   : > { %v465_v44 = vclamps-f32 %v301_v43, 1.0 }
  0xef   : > { %v304_v46 = vadd.f32 1.0, %v465_v44 }
  0xf1   : > { %v305_v47 = vmul.f32 %v304_v46, %v262_v45 }
  0xf3   : > { %v306_v48 = vsel %vm226_vm0, %v305_v47, 0.0  ;;  %v317_v49 = vmul.f32 %v305_v47, %v305_v47 }
  0xf4   : > { %307 = vadd.xlane.f32.xlu0 %v306_v48 }
  0xf5   : > { %v318_v50 = vsel %vm226_vm0, %v317_v49, 0.0 }
  0xfc   : > { %319 = vadd.xlane.f32.xlu0 %v318_v50 }
 0x167   : > { %v308_v57 = vpop.xlane.xlu0 %307 }
 0x168   : > { %v316_v59 = vmul.f32 %v315_v58, %v308_v57 }
 0x16a   : > { %v322_v61 = vmul.f32 %v316_v59, %v316_v59  ;;  %v336_v10 = vsub.f32 %v305_v47, %v316_v59 }
 0x16f   : > { %v320_v60 = vpop.xlane.xlu0 %319 }
 0x170   : > { %v321_v62 = vmul.f32 %v320_v60, %v315_v58 }
 0x172   : > { %v323_v63 = vsub.f32 %v321_v62, %v322_v61 }
 0x174   : > { %v324_v0 = vmax.f32 %v323_v63, 0.0 }
 0x176   : > { %v325_v1 = vadd.f32 1e-05, %v324_v0 }
 0x178   : > { %544 = vrsqrt.f32 %v325_v1  ;;  %vm332_vm7 = vweird.f32 %v325_v1 }
 0x17e   : > { %v545_v2 = vpop.eup %544 }
 0x17f   : > { %v327_v3 = vmul.f32 %v545_v2, %v325_v1  ;;  %vm333_vm6 = vweird.f32 %v545_v2 }
 0x180   : > { %vm334_vm8 = vmor %vm332_vm7, %vm333_vm6 }
 0x181   : > { %v328_v4 = vmul.f32 %v545_v2, %v327_v3 }
 0x183   : > { %v329_v6 = vmul.f32 0.5, %v328_v4 }
 0x185   : > { %v330_v7 = vsub.f32 1.5, %v329_v6 }
 0x187   : > { %v331_v8 = vmul.f32 %v545_v2, %v330_v7 }
 0x189   : > { %v335_v11 = vsel %vm334_vm8, %v545_v2, %v331_v8 }
 0x18a   : > { %v337_v13 = vmul.f32 %v336_v10, %v335_v11 }
 0x18c   : > { %v339_v14 = vmul.f32 %v338_v9, %v337_v13 }
 0x18e   : > { %v341_v15 = vadd.f32 %v340_v12, %v339_v14 }
 0x190   : > { %342 = vst.msk [vmem:[%s218_s26] sm:$0xff] %vm226_vm0, %v341_v15 }
 0x191   : > { %663 = shalt.err (!%p660_p9)
}
 0x192   : > { %480 = dma.vmem_to_hbm [thread:$0]  (%p802_p4), %s357_s27, 128, %s359_s19, %s344_s28  }
 0x193 PF: > { %s370_s10 = sand.u32 1, %s694_s12   ;;  %p905_p10 = scmp.ge.s32.totalorder %s706_s15, 2 }
 0x194   : > { %s371_s21 = scalar_lea.sflag [#allocation4], %s370_s10 }
 0x195   : > { %p494_p13 = pnand %p905_p10, %p806_p6 }
 0x197   : > { %p495_p11 = pneg %p494_p13 }
 0x199   : > { %689 = dma.done.wait (%p495_p11), %s371_s21, 128  }
 0x19a   : > { %691 = vsyncadd (%p495_p11), %s371_s21, 4294967168  ;;  %p17_p0 = scmp.ge.s32.totalorder %s776_s4, 4   ;;  %s906_s12 = smov %s698_s13 }
 0x19b   : > { %s907_s13 = smov %s702_s14  ;;  %s908_s14 = smov %s787_s7 }
 0x19c   : > { %s909_s15 = smov %s776_s4  ;;  %19 = sbr.rel (!%p17_p0) target bundleno = 6 (0x6), region = 85 }
 0x1a1   :  { %377 = vsyncpa [#allocation3], 1 }
 0x1a2   :  { %379 = vsyncpa [#allocation3 + $0x1], 1 }
 0x1a3   :  { %380 = vsyncpa [#allocation6], 1 }
 0x1a4   :  { %381 = vsyncpa [#allocation4], 1 }
 0x1a5   :  { %383 = vsyncpa [#allocation4 + $0x1], 1 }

</bundles_post_ra>
